<compile_context>
chip_gen: v5e
topology: v5e:2x2
jax: 0.10.0
libtpu: 0.0.40
codegen_flags: <defaults>
</compile_context>

<pallas_src>
import jax
import jax.numpy as jnp
from jax.experimental import pallas as pl
from jax.experimental.pallas import tpu as pltpu


def _proj_kernel(x_ref, w_ref, o_ref):
    # One (tm, K) tile of tokens x one (K, tn) slab of the weight ->
    # one (tm, tn) output tile.  K (vision_dim) is never tiled, so there is
    # no reduction grid axis and no accumulator scratch is needed.
    o_ref[...] = jnp.dot(
        x_ref[...], w_ref[...], preferred_element_type=jnp.float32
    ).astype(o_ref.dtype)


def _round_up(x, m):
    return ((x + m - 1) // m) * m


def _choose_tm(M):
    # MXU-sized token tiles: multiples of 256 match the v6e/v7x 256-wide MXU
    # and are also multiples of v5e's 128-wide MXU.  Tiny inputs get a single
    # grid step (per-step overhead would dominate a micro-matmul otherwise).
    if M <= 256:
        return _round_up(M, 8)
    if M <= 2048:
        return 256  # keeps the grid length >= 2 so both v7x TensorCores work
    return 512


def _choose_tn(N):
    # Lane-dense output tiles (multiple of 128 -> unmasked vst) when N is
    # large; otherwise the full N as one block (block == full array dim
    # satisfies the (8,128) rule).  Tiling N also bounds per-step VMEM.
    if N <= 512 or N % 128 != 0:
        return N
    for tn in (512, 384, 256, 128):
        if N % tn == 0:
            return tn
    return N


def vision_projector(x, w):
    """Pallas equivalent of VisionProjector.forward.

    x: (B, S, K)  activations, K = vision_dim
    w: (K, N)     weight stored as W_pt.T (N = proj_dim), so out = x @ w
    returns (B, S, N), same dtype as x.
    """
    B, S, K = x.shape
    Kw, N = w.shape
    assert K == Kw, (K, Kw)

    M = B * S
    x2 = x.reshape(M, K)

    tm = _choose_tm(M)
    tn = _choose_tn(N)

    # Pad the token dim so the grid tiles it exactly (no divisibility assert).
    Mp = _round_up(M, tm)
    if Mp != M:
        x2 = jnp.pad(x2, ((0, Mp - M), (0, 0)))

    grid = (Mp // tm, N // tn)

    itemsize = jnp.dtype(x.dtype).itemsize
    # Budget: double-buffered x/out tiles + weight slab (+ 2x headroom),
    # floored at 32 MiB (v5e default scoped limit is only 16 MiB) and capped
    # at 64 MiB (v7x physical VMEM).
    vmem_need = 2 * (tm * K + K * tn + tm * tn) * max(itemsize, 4)
    vmem_limit = int(min(max(2 * vmem_need, 32 * 1024 * 1024),
                         64 * 1024 * 1024))

    cost = pl.CostEstimate(
        flops=2 * M * K * N,
        transcendentals=0,
        bytes_accessed=(M * K + K * N + M * N) * itemsize,
    )

    out2 = pl.pallas_call(
        _proj_kernel,
        out_shape=jax.ShapeDtypeStruct((Mp, N), x.dtype),
        grid_spec=pltpu.PrefetchScalarGridSpec(
            num_scalar_prefetch=0,
            grid=grid,
            in_specs=[
                pl.BlockSpec((tm, K), lambda i, j: (i, 0)),
                # Weight slab; when N is untiled its block index is constant,
                # so Pallas skips re-fetching it across grid steps.
                pl.BlockSpec((K, tn), lambda i, j: (0, j)),
            ],
            out_specs=pl.BlockSpec((tm, tn), lambda i, j: (i, j)),
        ),
        compiler_params=pltpu.CompilerParams(
            dimension_semantics=("parallel", "parallel"),
            vmem_limit_bytes=vmem_limit,
        ),
        cost_estimate=cost,
    )(x2, w)

    if Mp != M:
        out2 = out2[:M]
    return out2.reshape(B, S, N)


if __name__ == "__main__":
    batch, seq, vision_dim, proj_dim = 2, 8, 32, 64

    key = jax.random.PRNGKey(0)
    kx, kw = jax.random.split(key)

    # --- f32 path (tight correctness check) -------------------------------
    x_f32 = jax.random.normal(kx, (batch, seq, vision_dim), jnp.float32)
    # nn.Linear weight is (proj_dim, vision_dim); store its transpose for x@W.
    w_pt = jax.random.normal(kw, (proj_dim, vision_dim), jnp.float32) * 0.02
    w_f32 = w_pt.T

    out = jax.block_until_ready(vision_projector(x_f32, w_f32))
    ref = jnp.einsum("bsk,nk->bsn", x_f32, w_pt)
    assert out.shape == (batch, seq, proj_dim)
    assert jnp.allclose(out, ref, atol=1e-5, rtol=1e-5)

    # --- bf16 path (MXU-native dtype, i.e. nn.Linear(dtype=bfloat16)) ------
    x_bf16 = x_f32.astype(jnp.bfloat16)
    w_bf16 = w_f32.astype(jnp.bfloat16)
    out_bf16 = jax.block_until_ready(vision_projector(x_bf16, w_bf16))
    ref_bf16 = jnp.einsum(
        "bsk,kn->bsn",
        x_bf16.astype(jnp.float32), w_bf16.astype(jnp.float32))
    assert out_bf16.dtype == jnp.bfloat16
    assert jnp.allclose(out_bf16.astype(jnp.float32), ref_bf16,
                        atol=5e-2, rtol=5e-2)

    # --- ragged-M path (exercises padding + multi-tile grid) ---------------
    x_rag = jax.random.normal(kx, (batch, 150, vision_dim), jnp.float32)
    out_rag = jax.block_until_ready(vision_projector(x_rag, w_f32))
    ref_rag = jnp.einsum("bsk,nk->bsn", x_rag, w_pt)
    assert jnp.allclose(out_rag, ref_rag, atol=1e-5, rtol=1e-5)

    print("KERNEL_OK")
</pallas_src>

<mosaic_0001>
module attributes {stable_mosaic.version = 11 : i64} {
  func.func @_proj_kernel(%arg0: i32, %arg1: i32, %arg2: memref<16x32xf32, #tpu.memory_space<vmem>>, %arg3: memref<32x64xf32, #tpu.memory_space<vmem>>, %arg4: memref<16x64xf32, #tpu.memory_space<vmem>>) attributes {dimension_semantics = [#tpu.dimension_semantics<parallel>, #tpu.dimension_semantics<parallel>], iteration_bounds = array<i64: 1, 1>, scalar_prefetch = 0 : i64, scratch_operands = 0 : i64, tpu.core_type = #tpu.core_type<tc>, window_params = [{transform_indices = @transform_0, window_bounds = array<i64: 16, 32>}, {transform_indices = @transform_1, window_bounds = array<i64: 32, 64>}, {transform_indices = @transform_2, window_bounds = array<i64: 16, 64>}]} {
    %c0 = arith.constant 0 : index
    %c0_0 = arith.constant 0 : index
    %0 = vector.load %arg2[%c0, %c0_0] : memref<16x32xf32, #tpu.memory_space<vmem>>, vector<16x32xf32>
    %c0_1 = arith.constant 0 : index
    %c0_2 = arith.constant 0 : index
    %1 = vector.load %arg3[%c0_1, %c0_2] : memref<32x64xf32, #tpu.memory_space<vmem>>, vector<32x64xf32>
    %cst = arith.constant dense<0.000000e+00> : vector<16x64xf32>
    %2 = tpu.matmul %0, %1, %cst {dimension_numbers = #tpu.dot_dimension_numbers<[1], [0], [0], [1], [0, 0, 1, 1], [], []>} : vector<16x32xf32>, vector<32x64xf32>, vector<16x64xf32> -> vector<16x64xf32>
    %c0_3 = arith.constant 0 : index
    %c0_4 = arith.constant 0 : index
    %3 = vector.load %arg4[%c0_3, %c0_4] : memref<16x64xf32, #tpu.memory_space<vmem>>, vector<16x64xf32>
    tpu.vector_store %arg4[%c0_3, %c0_4], %2 {strides = array<i32>} : memref<16x64xf32, #tpu.memory_space<vmem>>, vector<16x64xf32>,
    return
  }
  func.func @transform_0(%arg0: i32, %arg1: i32) -> (i32, i32) {
    %c0_i32 = arith.constant 0 : i32
    %c0_i32_0 = arith.constant 0 : i32
    return %arg0, %c0_i32 : i32, i32
  }
  func.func @transform_1(%arg0: i32, %arg1: i32) -> (i32, i32) {
    %c0_i32 = arith.constant 0 : i32
    %c0_i32_0 = arith.constant 0 : i32
    return %c0_i32, %arg1 : i32, i32
  }
  func.func @transform_2(%arg0: i32, %arg1: i32) -> (i32, i32) {
    %c0_i32 = arith.constant 0 : i32
    return %arg0, %arg1 : i32, i32
  }
}

</mosaic_0001>

<bundles_post_ra>
// kernel: tpu_custom_call.1
= control target key start
LH: loop header
LB: loop body
LE: loop exit
PB: predicated region body
PF: predicated region fallthrough
CT: control target
= control target key end

     0   :  { %7 = vsyncpa [#allocation3], 0  ;;  %s230_s0 = inlined_call_operand.hbm [shape: f32[16,32], index: 0, kind: input, shape index: {}]   ;;  %s231_s1 = inlined_call_operand.hbm [shape: f32[32,64], index: 1, kind: input, shape index: {}]   ;;  %s232_s2 = inlined_call_operand.hbm [shape: f32[16,64], index: 2, kind: output, shape index: {}]  }
   0x1   :  { %8 = vsyncpa [#allocation6], 0 }
   0x2   :  { %9 = vsyncpa [#allocation4], 0  ;;  %s14_s11 = sshll.u32 %s230_s0, 4  ;;  %s192_s12 = smov [#allocation2]   ;;  %s15_s11 = int_to_ptr.hbm [resolvable:$true] %s14_s11 }
   0x3   :  { %s16_s13 = sshll.u32 %s192_s12, 4  ;;  %s27_s16 = sshll.u32 %s231_s1, 4  ;;  %s17_s13 = int_to_ptr.vmem [resolvable:$true] %s16_s13  ;;  %s28_s16 = int_to_ptr.hbm [resolvable:$true] %s27_s16 }
   0x4   :  { %s193_s17 = smov 128   ;;  %s194_s18 = smov 8  }
   0x5   :  { %22 = dma.hbm_to_vmem [thread:$0]  %s15_s11, 256, %s17_s13, [#allocation3], %s193_s17, %s193_s17, %s194_s18  }
   0x6   :  { %s195_s19 = smov [#allocation5]  }
   0x7   :  { %s29_s20 = sshll.u32 %s195_s19, 4  ;;  %s30_s20 = int_to_ptr.vmem [resolvable:$true] %s29_s20 }
   0x8   :  { %35 = dma.hbm_to_vmem [thread:$0]  %s28_s16, 512, %s30_s20, [#allocation6], %s193_s17, %s193_s17, %s194_s18  }
   0x9   :  { %186 = dma.done.wait [#allocation3], 256  }
   0xa   :  { %187 = vsyncadd [#allocation3], 4294967040 }
   0xb   :  { %188 = dma.done.wait [#allocation6], 512  }
   0xc   :  { %189 = vsyncadd [#allocation6], 4294966784  ;;  %v49_v0 = vld [vmem:[#allocation5 + $0x18] sm:$0xff]  ;;  %v48_v1 = vld [vmem:[#allocation5 + $0x10] sm:$0xff]  ;;  %vm50_vm0 = vcmask 261120   ;;  %s196_s0 = smov [#allocation7]  }
   0xd   :  { %69 = vmatpush.msra.mxu0 %v49_v0  ;;  %105 = vmatpush.msra.mxu1 %v49_v0  ;;  %v47_v2 = vld [vmem:[#allocation5 + $0x8] sm:$0xff]  ;;  %v46_v3 = vld [vmem:[#allocation5] sm:$0xff]  ;;  %v44_v4 = vld [vmem:[#allocation2] sm:$0xff]  ;;  %s87_s1 = sshll.u32 %s196_s0, 4  ;;  %s89_s23 = sshll.u32 %s232_s2, 4  ;;  %vm80_vm1 = vcmask 523264   ;;  %s88_s1 = int_to_ptr.vmem [resolvable:$true] %s87_s1  ;;  %s90_s23 = int_to_ptr.hbm [resolvable:$true] %s89_s23 }
   0xe   :  { %v45_v5 = vld [vmem:[#allocation2 + $0x8] sm:$0xff] }
   0xf   :  { %70 = vmatpush.msra.mxu0 %v48_v1  ;;  %106 = vmatpush.msra.mxu1 %v48_v1 }
  0x11   :  { %71 = vmatpush.msra.mxu0 %v47_v2  ;;  %107 = vmatpush.msra.mxu1 %v47_v2 }
  0x13   :  { %72 = vmatpush.msra.mxu0 %v46_v3  ;;  %108 = vmatpush.msra.mxu1 %v46_v3 }
  0x14   :  { %103 = vmatmul.msk.f32.vlgmr.msra.gmra.mxu0 %vm50_vm0, %v44_v4  ;;  %104 = vmatmul.msk.f32.vlgmr.msra.gmra.mxu1 %vm50_vm0, %v45_v5 }
  0x91   :  { %v74_v6 = vpop.f32.mrf.mxu0  ;;  %v77_v7 = vpop.f32.mrf.mxu1 }
  0x92   :  { %81 = vst.msk [vmem:[#allocation7] sm:$0xff] %vm80_vm1, %v74_v6 }
  0x93   :  { %82 = vst.msk [vmem:[#allocation7 + $0x8] sm:$0xff] %vm80_vm1, %v77_v7 }
  0x94   :  { %95 = dma.vmem_to_hbm [thread:$0]  %s88_s1, 256, %s90_s23, [#allocation4], %s193_s17, %s193_s17, %s194_s18  }
  0x95   :  { %190 = dma.done.wait [#allocation4], 256  }
  0x96   :  { %191 = vsyncadd [#allocation4], 4294967040 }
  0x97   :  { %100 = vsyncpa [#allocation3], 1 }
  0x98   :  { %101 = vsyncpa [#allocation6], 1 }
  0x99   :  { %102 = vsyncpa [#allocation4], 1 }

</bundles_post_ra>
